<compile_context>
chip_gen: v5e
topology: v5e:2x2
jax: 0.10.0
libtpu: 0.0.40
codegen_flags: <defaults>
</compile_context>

<pallas_src>
import jax
import jax.numpy as jnp
from jax import lax
from jax.experimental import pallas as pl
from jax.experimental.pallas import tpu as pltpu


# ---------------------------------------------------------------------------
# Fused CBAM kernel: one grid step = Bt batch elements, data layout (Bt, C, HW).
# ---------------------------------------------------------------------------
def _cbam_fused_kernel(x_ref, w1t_ref, w2t_ref, convm_ref, b_ref, out_ref):
    xv = x_ref[...]                                     # (Bt, C, HW) f32, VMEM resident
    bt = xv.shape[0]

    # ---- channel attention: adaptive max/avg pool over spatial (lane axis) ----
    mx = jnp.max(xv, axis=2)                            # (Bt, C)  AdaptiveMaxPool2d(1)
    av = jnp.mean(xv, axis=2)                           # (Bt, C)  AdaptiveAvgPool2d(1)
    pooled = jnp.concatenate([mx, av], axis=0)          # (2*Bt, C): both SE branches, all rows

    # Shared SE MLP (two bias-free 1x1 convs) on all branches/rows at once.
    h = jnp.dot(pooled, w1t_ref[...],
                preferred_element_type=jnp.float32)     # (2*Bt, Cr)
    h = jnp.maximum(h, 0.0)                             # ReLU
    z = jnp.dot(h, w2t_ref[...],
                preferred_element_type=jnp.float32)     # (2*Bt, C)
    ca = jax.nn.sigmoid(z[:bt] + z[bt:])                # (Bt, C): sigmoid(se(max)+se(avg))

    out_ca = xv * ca[:, :, None]                        # (Bt, C, HW) attended, stays in VMEM

    # ---- spatial attention on the VMEM-resident attended output ----
    cmx = jnp.max(out_ca, axis=1)                       # (Bt, HW) channel-wise max
    cav = jnp.mean(out_ca, axis=1)                      # (Bt, HW) channel-wise mean
    conv_lhs = jnp.concatenate([cmx, cav], axis=1)      # (Bt, 2*HW)

    # 7x7 SAME conv of the 2-channel pooled map == ONE matmul against the
    # precomputed dense operator (rows 0..HW-1: max channel, HW..2HW-1: avg).
    conv = jnp.dot(conv_lhs, convm_ref[...],
                   preferred_element_type=jnp.float32)  # (Bt, HW)
    sa = jax.nn.sigmoid(conv + b_ref[0])                # (Bt, HW) spatial attention

    out_ref[...] = out_ca * sa[:, None, :]              # sublane broadcast, full-lane stores


# ---------------------------------------------------------------------------
# Weight-only transform (done ONCE per weight set, NOT per forward):
# (1, 2, K, K) SAME-conv kernel -> dense (2*HW, HW) operator M such that
#   conv_flat = [pooled_max | pooled_mean] @ M
# M[(ci*HW + h_in*W + w_in), h_out*W + w_out] = w[ci, h_in-h_out+pad, w_in-w_out+pad]
# (zero when the tap falls outside the kernel window == zero padding).
# ---------------------------------------------------------------------------
def _conv_as_matrix(conv_w, H, W, K):
    pad = K // 2
    hi = jnp.arange(H)
    wi = jnp.arange(W)
    kh = hi[:, None] - hi[None, :] + pad                # (H_in, H_out)
    kw = wi[:, None] - wi[None, :] + pad                # (W_in, W_out)
    vh = (kh >= 0) & (kh < K)
    vw = (kw >= 0) & (kw < K)
    khc = jnp.clip(kh, 0, K - 1)
    kwc = jnp.clip(kw, 0, K - 1)
    w = conv_w[0]                                       # (2, K, K), O=1
    m = w[:, khc[:, :, None, None], kwc[None, None, :, :]]   # (2, Hin, Hout, Win, Wout)
    mask = (vh[:, :, None, None] & vw[None, None, :, :])[None, ...]
    m = m * mask.astype(w.dtype)
    m = jnp.transpose(m, (0, 1, 3, 2, 4)).reshape(2, H * W, H * W)  # (ci, hw_in, hw_out)
    return m.reshape(2 * H * W, H * W)


def prepare_cbam_params(w1, w2, conv_w, conv_b, H, W, kernel_size=7):
    """One-time weight preprocessing: transpose SE weights, build conv operator."""
    convm = _conv_as_matrix(jnp.asarray(conv_w, jnp.float32), H, W, kernel_size)
    return (jnp.asarray(w1, jnp.float32).T,             # (C, Cr)
            jnp.asarray(w2, jnp.float32).T,             # (Cr, C)
            convm,                                       # (2*HW, HW)
            jnp.asarray(conv_b, jnp.float32))            # (1,)


def _pick_batch_tile(B, C, HW, dtype_bytes=4, target_bytes=1 << 20):
    """Largest Bt that (a) keeps the block ~1 MiB, (b) divides B, and
    (c) leaves >= 2 grid steps when B >= 2 (so v7x's 2 TCs both get work)."""
    bt = max(1, min(B, target_bytes // max(1, C * HW * dtype_bytes)))
    if B >= 2:
        bt = min(bt, max(1, B // 2))
    while B % bt:
        bt -= 1
    return bt


# ---------------------------------------------------------------------------
# Wrapper / forward
# ---------------------------------------------------------------------------
def cbam_attention(x, w1t, w2t, convm, conv_b):
    """x: (B, C, H, W) f32. w1t: (C, Cr), w2t: (Cr, C), convm: (2*HW, HW), conv_b: (1,)."""
    B, C, H, W = x.shape
    HW = H * W
    Cr = w1t.shape[1]
    Bt = _pick_batch_tile(B, C, HW)

    x_flat = x.reshape(B, C, HW).astype(jnp.float32)    # lane-dense layout

    cost = pl.CostEstimate(
        flops=int(B * (2 * 2 * HW * HW + 8 * C * Cr + 8 * C * HW)),
        transcendentals=int(B * (C + HW)),               # sigmoids
        bytes_accessed=int(4 * (2 * B * C * HW + 2 * HW * HW + 4 * C * Cr)),
    )

    out_flat = pl.pallas_call(
        _cbam_fused_kernel,
        out_shape=jax.ShapeDtypeStruct((B, C, HW), jnp.float32),
        grid_spec=pltpu.PrefetchScalarGridSpec(
            num_scalar_prefetch=0,
            grid=(B // Bt,),
            in_specs=[
                pl.BlockSpec((Bt, C, HW), lambda i: (i, 0, 0)),      # x tile
                pl.BlockSpec((C, Cr), lambda i: (0, 0)),             # SE weight 1 (transposed)
                pl.BlockSpec((Cr, C), lambda i: (0, 0)),             # SE weight 2 (transposed)
                pl.BlockSpec((2 * HW, HW), lambda i: (0, 0)),        # conv operator (constant index -> fetched once)
                pl.BlockSpec(memory_space=pltpu.MemorySpace.SMEM),   # conv bias scalar
            ],
            out_specs=pl.BlockSpec((Bt, C, HW), lambda i: (i, 0, 0)),
        ),
        compiler_params=pltpu.CompilerParams(
            dimension_semantics=("parallel",),            # batch-tile axis shards across v7x TCs
        ),
        cost_estimate=cost,
    )(x_flat, w1t, w2t, convm, conv_b)

    return out_flat.reshape(B, C, H, W)


# ---------------------------------------------------------------------------
# Pure-JAX reference (mirrors the PyTorch forward); high precision for a tight check.
# ---------------------------------------------------------------------------
def cbam_reference(x, w1, w2, conv_w, conv_b):
    hp = lax.Precision.HIGHEST
    mx = jnp.max(x, axis=(2, 3), keepdims=True)
    av = jnp.mean(x, axis=(2, 3), keepdims=True)

    def se(v):
        h = jnp.einsum("rc,bcij->brij", w1, v, precision=hp)
        h = jnp.maximum(h, 0.0)
        return jnp.einsum("cr,brij->bcij", w2, h, precision=hp)

    ca = jax.nn.sigmoid(se(mx) + se(av))
    out = x * ca

    cmx = jnp.max(out, axis=1, keepdims=True)
    cav = jnp.mean(out, axis=1, keepdims=True)
    stacked = jnp.concatenate([cmx, cav], axis=1)                         # (B, 2, H, W)
    conv = lax.conv_general_dilated(stacked, conv_w, (1, 1), "SAME",
                                    precision=hp)                         # NCHW / OIHW
    sa = jax.nn.sigmoid(conv + conv_b.reshape(1, 1, 1, 1))
    return out * sa


if __name__ == "__main__":
    # Small shapes consistent with the module: channel=32, reduction=16, k=7.
    B, C, H, W = 2, 32, 16, 16
    reduction, K = 16, 7
    Cr = C // reduction

    key = jax.random.PRNGKey(0)
    kx, k1, k2, kw, kb = jax.random.split(key, 5)
    x = jax.random.normal(kx, (B, C, H, W), dtype=jnp.float32)
    # Deterministic synthetic parameters (shapes from the module __init__).
    w1 = jax.random.normal(k1, (Cr, C), dtype=jnp.float32) * 0.1     # Conv2d(C, C//r, 1, bias=False)
    w2 = jax.random.normal(k2, (C, Cr), dtype=jnp.float32) * 0.1     # Conv2d(C//r, C, 1, bias=False)
    conv_w = jax.random.normal(kw, (1, 2, K, K), dtype=jnp.float32) * 0.05  # Conv2d(2, 1, 7, padding=3)
    conv_b = jax.random.normal(kb, (1,), dtype=jnp.float32) * 0.05

    # Weight-only preprocessing: done ONCE, not per forward call.
    params = prepare_cbam_params(w1, w2, conv_w, conv_b, H, W, kernel_size=K)
    params = jax.block_until_ready(params)

    forward = jax.jit(cbam_attention)
    out = jax.block_until_ready(forward(x, *params))

    ref = cbam_reference(x, w1, w2, conv_w, conv_b)
    assert out.shape == (B, C, H, W)
    assert jnp.allclose(out, ref, atol=5e-4, rtol=5e-4), (
        f"max abs diff {jnp.max(jnp.abs(out - ref))}"
    )
    print("KERNEL_OK")
</pallas_src>

<mosaic_0001>
module attributes {stable_mosaic.version = 11 : i64} {
  func.func @_cbam_fused_kernel(%arg0: i32, %arg1: memref<1x32x256xf32, #tpu.memory_space<vmem>>, %arg2: memref<32x2xf32, #tpu.memory_space<vmem>>, %arg3: memref<2x32xf32, #tpu.memory_space<vmem>>, %arg4: memref<512x256xf32, #tpu.memory_space<vmem>>, %arg5: memref<1xf32, #tpu.memory_space<smem>>, %arg6: memref<1x32x256xf32, #tpu.memory_space<vmem>>) attributes {dimension_semantics = [#tpu.dimension_semantics<parallel>], iteration_bounds = array<i64: 2>, scalar_prefetch = 0 : i64, scratch_operands = 0 : i64, tpu.core_type = #tpu.core_type<tc>, window_params = [{transform_indices = @transform_0, window_bounds = array<i64: 1, 32, 256>}, {pipeline_mode = #tpu.pipeline_mode<synchronous>, transform_indices = @transform_1, window_bounds = array<i64: 32, 2>}, {pipeline_mode = #tpu.pipeline_mode<synchronous>, transform_indices = @transform_2, window_bounds = array<i64: 2, 32>}, {pipeline_mode = #tpu.pipeline_mode<synchronous>, transform_indices = @transform_3, window_bounds = array<i64: 512, 256>}, {transform_indices = @transform_4, window_bounds = array<i64: 1>}, {transform_indices = @transform_5, window_bounds = array<i64: 1, 32, 256>}]} {
    %c0 = arith.constant 0 : index
    %c0_0 = arith.constant 0 : index
    %c0_1 = arith.constant 0 : index
    %0 = vector.load %arg1[%c0, %c0_0, %c0_1] : memref<1x32x256xf32, #tpu.memory_space<vmem>>, vector<1x32x256xf32>
    %cst = arith.constant dense<0xFF800000> : vector<1x32xf32>
    %1 = vector.multi_reduction <maximumf>, %0, %cst [2] : vector<1x32x256xf32> to vector<1x32xf32>
    %cst_2 = arith.constant dense<0.000000e+00> : vector<1x32xf32>
    %2 = vector.multi_reduction <add>, %0, %cst_2 [2] : vector<1x32x256xf32> to vector<1x32xf32>
    %cst_3 = arith.constant 2.560000e+02 : f32
    %3 = vector.broadcast %cst_3 : f32 to vector<1x32xf32>
    %4 = arith.divf %2, %3 : vector<1x32xf32>
    %5 = tpu.concatenate %1, %4 in 0 : vector<1x32xf32>, vector<1x32xf32> -> vector<2x32xf32>
    %c0_4 = arith.constant 0 : index
    %c0_5 = arith.constant 0 : index
    %6 = vector.load %arg2[%c0_4, %c0_5] : memref<32x2xf32, #tpu.memory_space<vmem>>, vector<32x2xf32>
    %cst_6 = arith.constant dense<0.000000e+00> : vector<2x2xf32>
    %7 = tpu.matmul %5, %6, %cst_6 {dimension_numbers = #tpu.dot_dimension_numbers<[1], [0], [0], [1], [0, 0, 1, 1], [], []>} : vector<2x32xf32>, vector<32x2xf32>, vector<2x2xf32> -> vector<2x2xf32>
    %cst_7 = arith.constant 0.000000e+00 : f32
    %8 = vector.broadcast %cst_7 : f32 to vector<2x2xf32>
    %9 = arith.maximumf %7, %8 : vector<2x2xf32>
    %c0_8 = arith.constant 0 : index
    %c0_9 = arith.constant 0 : index
    %10 = vector.load %arg3[%c0_8, %c0_9] : memref<2x32xf32, #tpu.memory_space<vmem>>, vector<2x32xf32>
    %cst_10 = arith.constant dense<0.000000e+00> : vector<2x32xf32>
    %11 = tpu.matmul %9, %10, %cst_10 {dimension_numbers = #tpu.dot_dimension_numbers<[1], [0], [0], [1], [0, 0, 1, 1], [], []>} : vector<2x2xf32>, vector<2x32xf32>, vector<2x32xf32> -> vector<2x32xf32>
    %12 = vector.extract_strided_slice %11 {offsets = [0, 0], sizes = [1, 32], strides = [1, 1]} : vector<2x32xf32> to vector<1x32xf32>
    %13 = vector.extract_strided_slice %11 {offsets = [1, 0], sizes = [1, 32], strides = [1, 1]} : vector<2x32xf32> to vector<1x32xf32>
    %14 = arith.addf %12, %13 : vector<1x32xf32>
    %15 = arith.negf %14 : vector<1x32xf32>
    %16 = math.exp %15 : vector<1x32xf32>
    %cst_11 = arith.constant 1.000000e+00 : f32
    %17 = vector.broadcast %cst_11 : f32 to vector<1x32xf32>
    %18 = arith.addf %17, %16 : vector<1x32xf32>
    %19 = arith.divf %17, %18 : vector<1x32xf32>
    %20 = vector.shape_cast %19 : vector<1x32xf32> to vector<1x32x1xf32>
    %21 = vector.broadcast %20 : vector<1x32x1xf32> to vector<1x32x256xf32>
    %22 = arith.mulf %0, %21 : vector<1x32x256xf32>
    %cst_12 = arith.constant dense<0xFF800000> : vector<1x256xf32>
    %23 = vector.multi_reduction <maximumf>, %22, %cst_12 [1] : vector<1x32x256xf32> to vector<1x256xf32>
    %cst_13 = arith.constant dense<0.000000e+00> : vector<1x256xf32>
    %24 = vector.multi_reduction <add>, %22, %cst_13 [1] : vector<1x32x256xf32> to vector<1x256xf32>
    %cst_14 = arith.constant 3.200000e+01 : f32
    %25 = vector.broadcast %cst_14 : f32 to vector<1x256xf32>
    %26 = arith.divf %24, %25 : vector<1x256xf32>
    %27 = tpu.concatenate %23, %26 in 1 : vector<1x256xf32>, vector<1x256xf32> -> vector<1x512xf32>
    %c0_15 = arith.constant 0 : index
    %c0_16 = arith.constant 0 : index
    %28 = vector.load %arg4[%c0_15, %c0_16] : memref<512x256xf32, #tpu.memory_space<vmem>>, vector<512x256xf32>
    %cst_17 = arith.constant dense<0.000000e+00> : vector<1x256xf32>
    %29 = tpu.matmul %27, %28, %cst_17 {dimension_numbers = #tpu.dot_dimension_numbers<[1], [0], [0], [1], [0, 0, 1, 1], [], []>} : vector<1x512xf32>, vector<512x256xf32>, vector<1x256xf32> -> vector<1x256xf32>
    %c0_18 = arith.constant 0 : index
    %30 = memref.load %arg5[%c0_18] : memref<1xf32, #tpu.memory_space<smem>>
    %31 = vector.broadcast %30 : f32 to vector<1x256xf32>
    %32 = arith.addf %29, %31 : vector<1x256xf32>
    %33 = arith.negf %32 : vector<1x256xf32>
    %34 = math.exp %33 : vector<1x256xf32>
    %cst_19 = arith.constant 1.000000e+00 : f32
    %35 = vector.broadcast %cst_19 : f32 to vector<1x256xf32>
    %36 = arith.addf %35, %34 : vector<1x256xf32>
    %37 = arith.divf %35, %36 : vector<1x256xf32>
    %38 = vector.shape_cast %37 : vector<1x256xf32> to vector<1x1x256xf32>
    %39 = vector.broadcast %38 : vector<1x1x256xf32> to vector<1x32x256xf32>
    %40 = arith.mulf %22, %39 : vector<1x32x256xf32>
    %c0_20 = arith.constant 0 : index
    %c0_21 = arith.constant 0 : index
    %c0_22 = arith.constant 0 : index
    %41 = vector.load %arg6[%c0_20, %c0_21, %c0_22] : memref<1x32x256xf32, #tpu.memory_space<vmem>>, vector<1x32x256xf32>
    tpu.vector_store %arg6[%c0_20, %c0_21, %c0_22], %40 {strides = array<i32>} : memref<1x32x256xf32, #tpu.memory_space<vmem>>, vector<1x32x256xf32>,
    return
  }
  func.func @transform_0(%arg0: i32) -> (i32, i32, i32) {
    %c0_i32 = arith.constant 0 : i32
    %c0_i32_0 = arith.constant 0 : i32
    %c0_i32_1 = arith.constant 0 : i32
    return %arg0, %c0_i32, %c0_i32_0 : i32, i32, i32
  }
  func.func @transform_1(%arg0: i32) -> (i32, i32) {
    %c0_i32 = arith.constant 0 : i32
    %c0_i32_0 = arith.constant 0 : i32
    %c0_i32_1 = arith.constant 0 : i32
    return %c0_i32, %c0_i32_0 : i32, i32
  }
  func.func @transform_2(%arg0: i32) -> (i32, i32) {
    %c0_i32 = arith.constant 0 : i32
    %c0_i32_0 = arith.constant 0 : i32
    %c0_i32_1 = arith.constant 0 : i32
    return %c0_i32, %c0_i32_0 : i32, i32
  }
  func.func @transform_3(%arg0: i32) -> (i32, i32) {
    %c0_i32 = arith.constant 0 : i32
    %c0_i32_0 = arith.constant 0 : i32
    %c0_i32_1 = arith.constant 0 : i32
    return %c0_i32, %c0_i32_0 : i32, i32
  }
  func.func @transform_4(%arg0: i32) -> i32 {
    %c0_i32 = arith.constant 0 : i32
    %c0_i32_0 = arith.constant 0 : i32
    return %c0_i32 : i32
  }
  func.func @transform_5(%arg0: i32) -> (i32, i32, i32) {
    %c0_i32 = arith.constant 0 : i32
    %c0_i32_0 = arith.constant 0 : i32
    %c0_i32_1 = arith.constant 0 : i32
    return %arg0, %c0_i32, %c0_i32_0 : i32, i32, i32
  }
}

</mosaic_0001>

<bundles_post_ra>
// kernel: cbam_attention.1
= control target key start
LH: loop header
LB: loop body
LE: loop exit
PB: predicated region body
PF: predicated region fallthrough
CT: control target
= control target key end

     0   :  { %s1165_s0 = inlined_call_operand.vmem [shape: f32[2,32,256], index: 0, kind: input, shape index: {}]   ;;  %s1166_s1 = inlined_call_operand.vmem [shape: f32[32,2], index: 1, kind: input, shape index: {}]   ;;  %s1167_s2 = inlined_call_operand.vmem [shape: f32[2,32], index: 2, kind: input, shape index: {}]   ;;  %s1168_s3 = inlined_call_operand.hbm [shape: f32[512,256], index: 3, kind: input, shape index: {}]   ;;  %s1169_s4 = inlined_call_operand.<no memory space> [shape: f32[1], index: 4, kind: input, shape index: {}]   ;;  %s1170_s5 = inlined_call_operand.vmem [shape: f32[2,32,256], index: 5, kind: output, shape index: {}]  }
   0x1   :  { %10 = sst [smem:[#allocation2]] %s1169_s4 }
   0x2   :  { %11 = vsyncpa [#allocation4], 0  ;;  %s1037_s20 = smov 0  }
   0x3 LB: > { %s175_s23 = sshll.u32 %s1168_s3, 4  ;;  %s892_s24 = sadd.s32 4294967295, %s997_s20   ;;  %s997_s20 = sphi %s1037_s20, %s17_s20   ;;  %s176_s23 = int_to_ptr.hbm [resolvable:$true] %s175_s23 }
   0x4   : > { %p894_p0 = scmp.ge.s32.totalorder %s997_s20, 1  ;;  %p158_p1 = scmp.lt.s32.totalorder %s997_s20, 3 }
   0x5   : > { %p921_p2 = scmp.eq.s32.totalorder %s892_s24, 0  ;;  %s999_s4 = smov [#allocation3]  }
   0x6   : > { %p159_p3 = pnand %p894_p0, %p158_p1  ;;  %s177_s25 = sshll.u32 %s999_s4, 4  ;;  %s178_s25 = int_to_ptr.vmem [resolvable:$true] %s177_s25 }
   0x7   : > { %s1000_s26 = smov 256   ;;  %s1001_s27 = smov 16  }
   0x8   : > { %p917_p4 = pneg %p159_p3  ;;  %204 = sbr.rel (%p159_p3) target bundleno = 766 (0x2fe), region = 40 }
   0xa   : > { %p918_p5 = pnand %p921_p2, %p917_p4 }
   0xc   : > { %920 = dma.hbm_to_vmem [thread:$0]  (!%p918_p5), %s176_s23, 16384, %s178_s25, [#allocation4], %s1000_s26, %s1000_s26, %s1001_s27  }
   0xd   : > { %992 = dma.done.wait (%p921_p2), [#allocation4], 16384  }
   0xe   : > { %994 = vsyncadd (%p921_p2), [#allocation4], 4294950912  ;;  %p233_p6 = scmp.lt.s32.totalorder %s892_s24, 1  ;;  %v1002_v16 = vmov 256.0   ;;  %v323_v17 = vld [vmem:[%s1166_s1 + $0x18] sm:$0xff]  ;;  %v322_v18 = vld [vmem:[%s1166_s1 + $0x10] sm:$0xff]  ;;  %v290_v29 = vlaneseq }
   0xf   : > { %941 = vrcp.f32 %v1002_v16  ;;  %340 = vmatpush.msra.mxu0 %v323_v17  ;;  %v321_v20 = vld [vmem:[%s1166_s1 + $0x8] sm:$0xff]  ;;  %v320_v21 = vld [vmem:[%s1166_s1] sm:$0xff]  ;;  %vm295_vm1 = vcmask 130112   ;;  %vm299_vm2 = vcmask 195712   ;;  %vm303_vm3 = vcmask 261312   ;;  %v541_v16 = vld [vmem:[#allocation3 + $0x1f0] sm:$0xff] }
  0x10   : > { %s1172_s24 = smov (!%p233_p6, %s892_s24), 1  ;;  %v291_v31 = vand.u32 127, %v290_v29  ;;  %vm318_vm4 = vcmask 1040384   ;;  %vm324_vm5 = vcmask 261120   ;;  %v349_v59 = vld [vmem:[%s1167_s2] sm:$0x3]  ;;  %629 = vmatpush.msra.mxu3 %v541_v16 }
  0x11   : > { %s911_s28 = sshll.u32 %s1172_s24, 6  ;;  %341 = vmatpush.msra.mxu0 %v322_v18  ;;  %vm354_vm6 = vcmask 1041408   ;;  %vm350_vm7 = vcmask 15360   ;;  %v1103_v62 = vshrl.u32 %v290_v29, 7  ;;  %v507_v17 = vld [vmem:[#allocation3 + $0xe0] sm:$0xff]  ;;  %v517_v16 = vld [vmem:[#allocation3 + $0x130] sm:$0xff] }
  0x12   : > { %s237_s6 = scalar_lea.vmem %s1165_s0, %s911_s28  ;;  %v293_v35 = vadd.s32 4294967288, %v291_v31  ;;  %v297_v38 = vadd.s32 4294967280, %v291_v31  ;;  %v301_v42 = vadd.s32 4294967272, %v291_v31  ;;  %904 = vmatpush.msk.msra.mxu1 %vm354_vm6, %v349_v59  ;;  %v539_v18 = vld [vmem:[#allocation3 + $0x1e0] sm:$0xff]  ;;  %s607_s17 = sld [smem:[#allocation2]] }
  0x13   : > { %v1056_v0 = vld [vmem:[%s237_s6 + $0x20] sm:$0xff]  ;;  %v1058_v1 = vld [vmem:[%s237_s6 + $0x28] sm:$0xff]  ;;  %v1066_v5 = vld [vmem:[%s237_s6 + $0x10] sm:$0xff]  ;;  %342 = vmatpush.msra.mxu0 %v321_v20  ;;  %936 = vset.pattern.permute.xlu2 %v1103_v62  ;;  %v416_v63 = vadd.s32 16, %v1103_v62  ;;  %s242_s21 = scalar_lea.vmem %s1170_s5, %s911_s28 }
  0x14   : > { %v1060_v2 = vld [vmem:[%s237_s6] sm:$0xff]  ;;  %v269_v3 = vadd.f32 %v1058_v1, %v1056_v0  ;;  %v1064_v4 = vld [vmem:[%s237_s6 + $0x8] sm:$0xff]  ;;  %v1068_v6 = vld [vmem:[%s237_s6 + $0x18] sm:$0xff]  ;;  %v257_v15 = vmax.f32 %v1056_v0, %v1058_v1  ;;  %630 = vmatpush.msra.mxu3 %v539_v18 }
  0x15   : > { %v263_v7 = vadd.f32 %v1064_v4, %v1060_v2  ;;  %v254_v8 = vmax.f32 %v1066_v5, %v1068_v6  ;;  %v1074_v9 = vld [vmem:[%s237_s6 + $0x30] sm:$0xff]  ;;  %v1076_v10 = vld [vmem:[%s237_s6 + $0x38] sm:$0xff]  ;;  %v251_v11 = vmax.f32 %v1060_v2, %v1064_v4  ;;  %v266_v12 = vadd.f32 %v1068_v6, %v1066_v5  ;;  %v942_v19 = vpop.eup %941  ;;  %343 = vmatpush.msra.mxu0 %v320_v21  ;;  %v491_v59 = vld [vmem:[#allocation3 + $0x60] sm:$0xff] }
  0x16   : > { %270 = vadd.xlane.f32.xlu1 %v269_v3  ;;  %v272_v13 = vadd.f32 %v1076_v10, %v1074_v9  ;;  %v260_v14 = vmax.f32 %v1074_v9, %v1076_v10  ;;  %v276_v22 = vmul.f32 256.0, %v942_v19  ;;  %vm280_vm0 = vweird.f32 %v942_v19  ;;  %v537_v21 = vld [vmem:[#allocation3 + $0x1d0] sm:$0xff] }
  0x17   : > { %264 = vadd.xlane.f32.xlu0 %v263_v7  ;;  %255 = vmax.xlane.f32.xlu2 %v254_v8  ;;  %v410_v3 = vadd.s32 8, %v1103_v62  ;;  %v585_v18 = vld [vmem:[#allocation3 + $0x350] sm:$0xff] }
  0x18   : > { %v277_v23 = vsub.f32 1.0, %v276_v22  ;;  %938 = vset.pattern.permute.xlu1 %v416_v63  ;;  %v573_v22 = vld [vmem:[#allocation3 + $0x2f0] sm:$0xff]  ;;  %631 = vmatpush.msra.mxu3 %v537_v21  ;;  %v551_v21 = vld [vmem:[#allocation3 + $0x240] sm:$0xff] }
  0x19   : > { %937 = vset.pattern.permute.xlu0 %v410_v3  ;;  %649 = vmatpush.msrb.mxu1 %v573_v22  ;;  %v489_v63 = vld [vmem:[#allocation3 + $0x50] sm:$0xff]  ;;  %v583_v22 = vld [vmem:[#allocation3 + $0x340] sm:$0xff] }
  0x1a   : > { %v278_v24 = vmul.f32 %v942_v19, %v277_v23  ;;  %v605_v23 = vld [vmem:[#allocation3 + $0x3f0] sm:$0xff] }
  0x1b   : > { %669 = vmatpush.msrb.mxu0 %v605_v23  ;;  %v521_v3 = vld [vmem:[#allocation3 + $0x150] sm:$0xff] }
  0x1c   : > { %v279_v28 = vadd.f32 %v942_v19, %v278_v24  ;;  %v481_v23 = vld [vmem:[#allocation3 + $0x10] sm:$0xff] }
  0x1e   : > { %252 = vmax.xlane.f32.xlu1 %v251_v11  ;;  %v281_v30 = vsel %vm280_vm0, %v942_v19, %v279_v28  ;;  %v505_v19 = vld [vmem:[#allocation3 + $0xd0] sm:$0xff]  ;;  %v535_v28 = vld [vmem:[#allocation3 + $0x1c0] sm:$0xff] }
  0x1f   : > { %267 = vadd.xlane.f32.xlu0 %v266_v12  ;;  %273 = vadd.xlane.f32.xlu2 %v272_v13 }
  0x20   : > { %632 = vmatpush.msra.mxu3 %v535_v28  ;;  %v511_v28 = vld [vmem:[#allocation3 + $0x100] sm:$0xff] }
  0x26   : > { %261 = vmax.xlane.f32.xlu1 %v260_v14 }
  0x27   : > { %258 = vmax.xlane.f32.xlu0 %v257_v15  ;;  %v509_v15 = vld [vmem:[#allocation3 + $0xf0] sm:$0xff] }
  0x28   : > { %609 = vmatpush.msra.mxu2 %v509_v15  ;;  %v485_v15 = vld [vmem:[#allocation3 + $0x30] sm:$0xff] }
  0x2a   : > { %610 = vmatpush.msra.mxu2 %v507_v17  ;;  %v553_v17 = vld [vmem:[#allocation3 + $0x250] sm:$0xff] }
  0x2c   : > { %611 = vmatpush.msra.mxu2 %v505_v19  ;;  %v483_v19 = vld [vmem:[#allocation3 + $0x20] sm:$0xff] }
  0x89   : > { %v271_v25 = vpop.xlane.xlu1 %270 }
  0x8a   : > { %v265_v26 = vpop.xlane.xlu0 %264  ;;  %v256_v27 = vpop.xlane.xlu2 %255  ;;  %v284_v39 = vmul.f32 %v281_v30, %v271_v25  ;;  %v571_v25 = vld [vmem:[#allocation3 + $0x2e0] sm:$0xff] }
  0x8b   : > { %v282_v33 = vmul.f32 %v281_v30, %v265_v26  ;;  %v294_v44 = vperm.slane %v256_v27, %v293_v35  ;;  %v603_v26 = vld [vmem:[#allocation3 + $0x3e0] sm:$0xff]  ;;  %650 = vmatpush.msrb.mxu1 %v571_v25  ;;  %v549_v25 = vld [vmem:[#allocation3 + $0x230] sm:$0xff] }
  0x8c   : > { %v313_v47 = vperm.slane %v284_v39, %v297_v38  ;;  %v503_v27 = vld [vmem:[#allocation3 + $0xc0] sm:$0xff]  ;;  %670 = vmatpush.msrb.mxu0 %v603_v26  ;;  %v581_v26 = vld [vmem:[#allocation3 + $0x330] sm:$0xff] }
  0x8d   : > { %v310_v41 = vperm.slane %v282_v33, %v291_v31  ;;  %v501_v33 = vld [vmem:[#allocation3 + $0xb0] sm:$0xff]  ;;  %612 = vmatpush.msra.mxu2 %v503_v27  ;;  %v499_v39 = vld [vmem:[#allocation3 + $0xa0] sm:$0xff] }
  0x8e   : > { %v479_v27 = vld [vmem:[#allocation3] sm:$0xff] }
  0x8f   : > { %613 = vmatpush.msra.mxu2 %v501_v33  ;;  %v545_v33 = vld [vmem:[#allocation3 + $0x210] sm:$0xff] }
  0x91   : > { %v253_v32 = vpop.xlane.xlu1 %252  ;;  %614 = vmatpush.msra.mxu2 %v499_v39  ;;  %v506_v39 = vld [vmem:[#allocation3 + $0xd8] sm:$0xff] }
  0x92   : > { %v268_v34 = vpop.xlane.xlu0 %267  ;;  %v274_v37 = vpop.xlane.xlu2 %273  ;;  %v292_v46 = vperm.slane %v253_v32, %v291_v31  ;;  %v601_v31 = vld [vmem:[#allocation3 + $0x3d0] sm:$0xff] }
  0x93   : > { %v283_v36 = vmul.f32 %v281_v30, %v268_v34  ;;  %v285_v43 = vmul.f32 %v281_v30, %v274_v37  ;;  %v569_v30 = vld [vmem:[#allocation3 + $0x2d0] sm:$0xff]  ;;  %v567_v37 = vld [vmem:[#allocation3 + $0x2c0] sm:$0xff]  ;;  %671 = vmatpush.msrb.mxu0 %v601_v31  ;;  %v510_v31 = vld [vmem:[#allocation3 + $0xf8] sm:$0xff] }
  0x94   : > { %v296_v54 = vsel %vm295_vm1, %v294_v44, %v292_v46  ;;  %v533_v34 = vld [vmem:[#allocation3 + $0x1b0] sm:$0xff]  ;;  %651 = vmatpush.msrb.mxu1 %v569_v30  ;;  %v422_v46 = vadd.s32 24, %v1103_v62  ;;  %v591_v62 = vld [vmem:[#allocation3 + $0x380] sm:$0xff] }
  0x95   : > { %v311_v40 = vperm.slane %v283_v36, %v293_v35  ;;  %v315_v49 = vperm.slane %v285_v43, %v301_v42  ;;  %633 = vmatpush.msra.mxu3 %v533_v34  ;;  %v579_v30 = vld [vmem:[#allocation3 + $0x320] sm:$0xff]  ;;  %v577_v34 = vld [vmem:[#allocation3 + $0x310] sm:$0xff] }
  0x96   : > { %652 = vmatpush.msrb.mxu1 %v567_v37  ;;  %v543_v37 = vld [vmem:[#allocation3 + $0x200] sm:$0xff] }
  0x97   : > { %v312_v45 = vsel %vm295_vm1, %v311_v40, %v310_v41  ;;  %v531_v40 = vld [vmem:[#allocation3 + $0x1a0] sm:$0xff] }
  0x98   : > { %v314_v53 = vsel %vm299_vm2, %v313_v47, %v312_v45  ;;  %634 = vmatpush.msra.mxu3 %v531_v40  ;;  %v497_v47 = vld [vmem:[#allocation3 + $0x90] sm:$0xff]  ;;  %v538_v40 = vld [vmem:[#allocation3 + $0x1d8] sm:$0xff] }
  0x99   : > { %v262_v48 = vpop.xlane.xlu1 %261  ;;  %v316_v57 = vsel %vm303_vm3, %v315_v49, %v314_v53  ;;  %v565_v49 = vld [vmem:[#allocation3 + $0x2b0] sm:$0xff]  ;;  %615 = vmatpush.msra.mxu2 %v497_v47  ;;  %v563_v53 = vld [vmem:[#allocation3 + $0x2a0] sm:$0xff]  ;;  %v502_v47 = vld [vmem:[#allocation3 + $0xb8] sm:$0xff] }
  0x9a   : > { %v259_v50 = vpop.xlane.xlu0 %258  ;;  %v302_v51 = vperm.slane %v262_v48, %v301_v42  ;;  %v529_v48 = vld [vmem:[#allocation3 + $0x190] sm:$0xff]  ;;  %653 = vmatpush.msrb.mxu1 %v565_v49  ;;  %v570_v49 = vld [vmem:[#allocation3 + $0x2d8] sm:$0xff] }
  0x9b   : > { %v298_v52 = vperm.slane %v259_v50, %v297_v38  ;;  %v599_v38 = vld [vmem:[#allocation3 + $0x3c0] sm:$0xff]  ;;  %635 = vmatpush.msra.mxu3 %v529_v48  ;;  %v597_v50 = vld [vmem:[#allocation3 + $0x3b0] sm:$0xff]  ;;  %v534_v48 = vld [vmem:[#allocation3 + $0x1b8] sm:$0xff] }
  0x9c   : > { %672 = vmatpush.msrb.mxu0 %v599_v38  ;;  %654 = vmatpush.msrb.mxu1 %v563_v53  ;;  %v575_v38 = vld [vmem:[#allocation3 + $0x300] sm:$0xff]  ;;  %v568_v53 = vld [vmem:[#allocation3 + $0x2c8] sm:$0xff] }
  0x9d   : > { %v300_v55 = vsel %vm299_vm2, %v298_v52, %v296_v54  ;;  %v527_v52 = vld [vmem:[#allocation3 + $0x180] sm:$0xff] }
  0x9e   : > { %v304_v56 = vsel %vm303_vm3, %v302_v51, %v300_v55  ;;  %v495_v51 = vld [vmem:[#allocation3 + $0x80] sm:$0xff]  ;;  %673 = vmatpush.msrb.mxu0 %v597_v50  ;;  %v493_v55 = vld [vmem:[#allocation3 + $0x70] sm:$0xff]  ;;  %636 = vmatpush.msra.mxu3 %v527_v52  ;;  %v602_v50 = vld [vmem:[#allocation3 + $0x3d8] sm:$0xff] }
  0x9f   : > { %v319_v58 = vsel %vm318_vm4, %v304_v56, %v316_v57  ;;  %v595_v54 = vld [vmem:[#allocation3 + $0x3a0] sm:$0xff]  ;;  %616 = vmatpush.msra.mxu2 %v495_v51  ;;  %v525_v56 = vld [vmem:[#allocation3 + $0x170] sm:$0xff]  ;;  %v500_v51 = vld [vmem:[#allocation3 + $0xa8] sm:$0xff] }
  0xa0   : > { %903 = vmatmul.msk.f32.vlgmr.msra.gmra.mxu0 %vm324_vm5, %v319_v58  ;;  %v561_v57 = vld [vmem:[#allocation3 + $0x290] sm:$0xff]  ;;  %637 = vmatpush.msra.mxu3 %v525_v56  ;;  %v532_v52 = vld [vmem:[#allocation3 + $0x1a8] sm:$0xff]  ;;  %v530_v56 = vld [vmem:[#allocation3 + $0x198] sm:$0xff] }
  0xa1   : > { %v593_v58 = vld [vmem:[#allocation3 + $0x390] sm:$0xff]  ;;  %674 = vmatpush.msrb.mxu0 %v595_v54  ;;  %617 = vmatpush.msra.mxu2 %v493_v55  ;;  %v600_v54 = vld [vmem:[#allocation3 + $0x3c8] sm:$0xff]  ;;  %v498_v55 = vld [vmem:[#allocation3 + $0x98] sm:$0xff] }
  0xa2   : > { %655 = vmatpush.msrb.mxu1 %v561_v57  ;;  %v566_v57 = vld [vmem:[#allocation3 + $0x2b8] sm:$0xff] }
  0xa3   : > { %675 = vmatpush.msrb.mxu0 %v593_v58  ;;  %618 = vmatpush.msra.mxu2 %v491_v59  ;;  %v598_v58 = vld [vmem:[#allocation3 + $0x3b8] sm:$0xff]  ;;  %v496_v59 = vld [vmem:[#allocation3 + $0x88] sm:$0xff] }
  0xa5   : > { %676 = vmatpush.msrb.mxu0 %v591_v62  ;;  %619 = vmatpush.msra.mxu2 %v489_v63  ;;  %v596_v62 = vld [vmem:[#allocation3 + $0x3a8] sm:$0xff]  ;;  %v494_v63 = vld [vmem:[#allocation3 + $0x78] sm:$0xff] }
 0x11d   : > { %v345_v60 = vpop.f32.mrf.mxu0 }
 0x11e   : > { %v348_v61 = vmax.f32 %v345_v60, 0.0  ;;  %v523_v60 = vld [vmem:[#allocation3 + $0x160] sm:$0xff] }
 0x11f   : > { %638 = vmatpush.msra.mxu3 %v523_v60  ;;  %v528_v60 = vld [vmem:[#allocation3 + $0x188] sm:$0xff] }
 0x120   : > { %905 = vmatmul.msk.f32.vlgmr.msra.gmra.mxu1 %vm350_vm7, %v348_v61  ;;  %v559_v61 = vld [vmem:[#allocation3 + $0x280] sm:$0xff] }
 0x121   : > { %656 = vmatpush.msrb.mxu1 %v559_v61  ;;  %639 = vmatpush.msra.mxu3 %v521_v3  ;;  %v564_v61 = vld [vmem:[#allocation3 + $0x2a8] sm:$0xff]  ;;  %v526_v3 = vld [vmem:[#allocation3 + $0x178] sm:$0xff] }
 0x19d   : > { %v375_v7 = vpop.f32.mrf.mxu1 }
 0x19e   : > { %v379_v8 = vrot.slane %v375_v7, 1 }
 0x1a0   : > { %v381_v11 = vadd.f32 %v379_v8, %v375_v7  ;;  %v557_v7 = vld [vmem:[#allocation3 + $0x270] sm:$0xff] }
 0x1a1   : > { %v589_v8 = vld [vmem:[#allocation3 + $0x370] sm:$0xff]  ;;  %657 = vmatpush.msrb.mxu1 %v557_v7  ;;  %v562_v7 = vld [vmem:[#allocation3 + $0x298] sm:$0xff] }
 0x1a2   : > { %v906_v12 = vmul.f32 -1.442695, %v381_v11  ;;  %v487_v11 = vld [vmem:[#allocation3 + $0x40] sm:$0xff]  ;;  %677 = vmatpush.msrb.mxu0 %v589_v8  ;;  %v594_v8 = vld [vmem:[#allocation3 + $0x398] sm:$0xff] }
 0x1a3   : > { %620 = vmatpush.msra.mxu2 %v487_v11  ;;  %v492_v11 = vld [vmem:[#allocation3 + $0x68] sm:$0xff] }
 0x1a4   : > { %943 = vpow2.f32 %v906_v12  ;;  %v519_v12 = vld [vmem:[#allocation3 + $0x140] sm:$0xff] }
 0x1a5   : > { %640 = vmatpush.msra.mxu3 %v519_v12  ;;  %621 = vmatpush.msra.mxu2 %v485_v15  ;;  %v524_v12 = vld [vmem:[#allocation3 + $0x168] sm:$0xff]  ;;  %v490_v15 = vld [vmem:[#allocation3 + $0x58] sm:$0xff] }
 0x1a7   : > { %641 = vmatpush.msra.mxu3 %v517_v16  ;;  %622 = vmatpush.msra.mxu2 %v483_v19  ;;  %v522_v16 = vld [vmem:[#allocation3 + $0x158] sm:$0xff]  ;;  %v488_v19 = vld [vmem:[#allocation3 + $0x48] sm:$0xff] }
 0x1a9   : > { %623 = vmatpush.msra.mxu2 %v481_v23  ;;  %v486_v23 = vld [vmem:[#allocation3 + $0x38] sm:$0xff] }
 0x1aa   : > { %v944_v13 = vpop.eup %943 }
 0x1ab   : > { %v385_v14 = vadd.f32 1.0, %v944_v13  ;;  %v555_v13 = vld [vmem:[#allocation3 + $0x260] sm:$0xff]  ;;  %624 = vmatpush.msra.mxu2 %v479_v27 }
 0x1ac   : > { %658 = vmatpush.msrb.mxu1 %v555_v13  ;;  %v560_v13 = vld [vmem:[#allocation3 + $0x288] sm:$0xff] }
 0x1ad   : > { %945 = vrcp.f32 %v385_v14  ;;  %v397_v32 = vand.u32 2147483648, %v385_v14  ;;  %v395_v36 = vand.u32 2147483647, %v385_v14  ;;  %vm391_vm9 = vweird.f32 %v385_v14  ;;  %689 = vmatpush.msrb.mxu2 %v510_v31  ;;  %v584_v31 = vld [vmem:[#allocation3 + $0x348] sm:$0xff] }
 0x1ae   : > { %659 = vmatpush.msrb.mxu1 %v553_v17  ;;  %v558_v17 = vld [vmem:[#allocation3 + $0x278] sm:$0xff] }
 0x1af   : > { %v398_v42 = vor.u32 1.1754944e-38, %v397_v32  ;;  %vm396_vm11 = vcmp.eq.f32.partialorder %v395_v36, 8.507059e+37  ;;  %v542_v32 = vld [vmem:[#allocation3 + $0x1f8] sm:$0xff]  ;;  %v540_v36 = vld [vmem:[#allocation3 + $0x1e8] sm:$0xff] }
 0x1b0   : > { %660 = vmatpush.msrb.mxu1 %v551_v21  ;;  %v556_v21 = vld [vmem:[#allocation3 + $0x268] sm:$0xff] }
 0x1b2   : > { %661 = vmatpush.msrb.mxu1 %v549_v25  ;;  %v554_v25 = vld [vmem:[#allocation3 + $0x258] sm:$0xff] }
 0x1b3   : > { %v946_v20 = vpop.eup %945 }
 0x1b4   : > { %v387_v24 = vmul.f32 %v946_v20, %v385_v14  ;;  %vm392_vm8 = vweird.f32 %v946_v20  ;;  %v587_v14 = vld [vmem:[#allocation3 + $0x360] sm:$0xff] }
 0x1b5   : > { %vm393_vm10 = vmor %vm391_vm9, %vm392_vm8  ;;  %678 = vmatpush.msrb.mxu0 %v587_v14  ;;  %v592_v14 = vld [vmem:[#allocation3 + $0x388] sm:$0xff] }
 0x1b6   : > { %v388_v29 = vsub.f32 1.0, %v387_v24  ;;  %v513_v24 = vld [vmem:[#allocation3 + $0x110] sm:$0xff] }
 0x1b7   : > { %679 = vmatpush.msrb.mxu0 %v585_v18  ;;  %v590_v18 = vld [vmem:[#allocation3 + $0x378] sm:$0xff] }
 0x1b8   : > { %v389_v35 = vmul.f32 %v946_v20, %v388_v29  ;;  %v547_v29 = vld [vmem:[#allocation3 + $0x220] sm:$0xff] }
 0x1b9   : > { %680 = vmatpush.msrb.mxu0 %v583_v22  ;;  %662 = vmatpush.msrb.mxu1 %v547_v29  ;;  %v588_v22 = vld [vmem:[#allocation3 + $0x368] sm:$0xff] }
 0x1ba   : > { %v390_v41 = vadd.f32 %v946_v20, %v389_v35  ;;  %v508_v35 = vld [vmem:[#allocation3 + $0xe8] sm:$0xff] }
 0x1bb   : > { %681 = vmatpush.msrb.mxu0 %v581_v26  ;;  %663 = vmatpush.msrb.mxu1 %v545_v33  ;;  %v586_v26 = vld [vmem:[#allocation3 + $0x358] sm:$0xff]  ;;  %v516_v29 = vld [vmem:[#allocation3 + $0x128] sm:$0xff] }
 0x1bc   : > { %v394_v43 = vsel %vm393_vm10, %v946_v20, %v390_v41  ;;  %v515_v20 = vld [vmem:[#allocation3 + $0x120] sm:$0xff]  ;;  %690 = vmatpush.msrb.mxu2 %v508_v35  ;;  %v574_v41 = vld [vmem:[#allocation3 + $0x2f8] sm:$0xff]  ;;  %v1003_v35 = vmov 32.0  }
 0x1bd   : > { %v399_v44 = vsel %vm396_vm11, %v398_v42, %v394_v43  ;;  %642 = vmatpush.msra.mxu3 %v515_v20  ;;  %682 = vmatpush.msrb.mxu0 %v579_v30  ;;  %v606_v42 = vld [vmem:[#allocation3 + $0x3f8] sm:$0xff]  ;;  %v504_v43 = vld [vmem:[#allocation3 + $0xc8] sm:$0xff]  ;;  %947 = vrcp.f32 %v1003_v35 }
 0x1be   : > { %v401_v45 = vperm.slane %v399_v44, 0  ;;  %664 = vmatpush.msrb.mxu1 %v543_v37  ;;  %691 = vmatpush.msrb.mxu2 %v506_v39  ;;  %v536_v44 = vld [vmem:[#allocation3 + $0x1c8] sm:$0xff]  ;;  %v514_v33 = vld [vmem:[#allocation3 + $0x118] sm:$0xff] }
 0x1bf   : > { %643 = vmatpush.msra.mxu3 %v513_v24  ;;  %683 = vmatpush.msrb.mxu0 %v577_v34  ;;  %v520_v20 = vld [vmem:[#allocation3 + $0x148] sm:$0xff]  ;;  %v518_v24 = vld [vmem:[#allocation3 + $0x138] sm:$0xff] }
 0x1c0   : > { %418 = vperm.xlu1 %938, %v401_v45   ;;  %412 = vperm.xlu0 %937, %v401_v45   ;;  %v552_v30 = vld [vmem:[#allocation3 + $0x248] sm:$0xff]  ;;  %v550_v34 = vld [vmem:[#allocation3 + $0x238] sm:$0xff] }
 0x1c1   : > { %406 = vperm.xlu2 %936, %v401_v45   ;;  %644 = vmatpush.msra.mxu3 %v511_v28  ;;  %v484_v28 = vld [vmem:[#allocation3 + $0x28] sm:$0xff] }
 0x1c2   : > { %684 = vmatpush.msrb.mxu0 %v575_v38  ;;  %729 = vmatpush.msra.mxu1 %v574_v41  ;;  %v480_v37 = vld [vmem:[#allocation3 + $0x8] sm:$0xff]  ;;  %v546_v41 = vld [vmem:[#allocation3 + $0x218] sm:$0xff] }
 0x1c3   : > { %709 = vmatpush.msrb.mxu3 %v542_v32  ;;  %692 = vmatpush.msrb.mxu2 %v504_v43  ;;  %v482_v32 = vld [vmem:[#allocation3 + $0x18] sm:$0xff]  ;;  %v512_v38 = vld [vmem:[#allocation3 + $0x108] sm:$0xff] }
 0x1c4   : > { %749 = vmatpush.msra.mxu0 %v606_v42  ;;  %v548_v39 = vld [vmem:[#allocation3 + $0x228] sm:$0xff]  ;;  %v578_v42 = vld [vmem:[#allocation3 + $0x318] sm:$0xff] }
 0x1c5   : > { %710 = vmatpush.msrb.mxu3 %v540_v36  ;;  %693 = vmatpush.msrb.mxu2 %v502_v47  ;;  %v582_v36 = vld [vmem:[#allocation3 + $0x338] sm:$0xff] }
 0x1c7   : > { %711 = vmatpush.msrb.mxu3 %v538_v40  ;;  %694 = vmatpush.msrb.mxu2 %v500_v51  ;;  %v580_v40 = vld [vmem:[#allocation3 + $0x328] sm:$0xff] }
 0x1c8   : > { %940 = vset.pattern.permute.xlu0 %v422_v46 }
 0x1c9   : > { %939 = vset.pattern.permute.xlu2 %v422_v46  ;;  %v604_v46 = vld [vmem:[#allocation3 + $0x3e8] sm:$0xff]  ;;  %712 = vmatpush.msrb.mxu3 %v536_v44 }
 0x1ca   : > { %750 = vmatpush.msra.mxu0 %v604_v46  ;;  %695 = vmatpush.msrb.mxu2 %v498_v55  ;;  %v544_v44 = vld [vmem:[#allocation3 + $0x208] sm:$0xff] }
 0x1cb   : > { %713 = vmatpush.msrb.mxu3 %v534_v48  ;;  %v576_v46 = vld [vmem:[#allocation3 + $0x308] sm:$0xff] }
 0x1cc   : > { %751 = vmatpush.msra.mxu0 %v602_v50  ;;  %696 = vmatpush.msrb.mxu2 %v496_v59 }
 0x1cd   : > { %714 = vmatpush.msrb.mxu3 %v532_v52 }
 0x1ce   : > { %752 = vmatpush.msra.mxu0 %v600_v54  ;;  %697 = vmatpush.msrb.mxu2 %v494_v63 }
 0x1cf   : > { %715 = vmatpush.msrb.mxu3 %v530_v56 }
 0x1d0   : > { %753 = vmatpush.msra.mxu0 %v598_v58  ;;  %698 = vmatpush.msrb.mxu2 %v492_v11 }
 0x1d1   : > { %424 = vperm.xlu2 %939, %v401_v45   ;;  %v572_v45 = vld [vmem:[#allocation3 + $0x2e8] sm:$0xff]  ;;  %716 = vmatpush.msrb.mxu3 %v528_v60 }
 0x1d2   : > { %730 = vmatpush.msra.mxu1 %v572_v45  ;;  %754 = vmatpush.msra.mxu0 %v596_v62  ;;  %v948_v45 = vpop.eup %947 }
 0x1d3   : > { %717 = vmatpush.msrb.mxu3 %v526_v3  ;;  %699 = vmatpush.msrb.mxu2 %v490_v15  ;;  %vm475_vm12 = vweird.f32 %v948_v45 }
 0x1d4   : > { %731 = vmatpush.msra.mxu1 %v570_v49  ;;  %755 = vmatpush.msra.mxu0 %v594_v8 }
 0x1d5   : > { %718 = vmatpush.msrb.mxu3 %v524_v12  ;;  %700 = vmatpush.msrb.mxu2 %v488_v19 }
 0x1d6   : > { %732 = vmatpush.msra.mxu1 %v568_v53  ;;  %756 = vmatpush.msra.mxu0 %v592_v14 }
 0x1d7   : > { %719 = vmatpush.msrb.mxu3 %v522_v16  ;;  %701 = vmatpush.msrb.mxu2 %v486_v23 }
 0x1d8   : > { %733 = vmatpush.msra.mxu1 %v566_v57  ;;  %757 = vmatpush.msra.mxu0 %v590_v18 }
 0x1d9   : > { %720 = vmatpush.msrb.mxu3 %v520_v20  ;;  %702 = vmatpush.msrb.mxu2 %v484_v28 }
 0x1da   : > { %734 = vmatpush.msra.mxu1 %v564_v61  ;;  %758 = vmatpush.msra.mxu0 %v588_v22 }
 0x1db   : > { %721 = vmatpush.msrb.mxu3 %v518_v24  ;;  %703 = vmatpush.msrb.mxu2 %v482_v32 }
 0x1dc   : > { %735 = vmatpush.msra.mxu1 %v562_v7  ;;  %759 = vmatpush.msra.mxu0 %v586_v26 }
 0x1dd   : > { %722 = vmatpush.msrb.mxu3 %v516_v29  ;;  %704 = vmatpush.msrb.mxu2 %v480_v37 }
 0x1de   : > { %736 = vmatpush.msra.mxu1 %v560_v13  ;;  %760 = vmatpush.msra.mxu0 %v584_v31 }
 0x1df   : > { %723 = vmatpush.msrb.mxu3 %v514_v33 }
 0x1e0   : > { %737 = vmatpush.msra.mxu1 %v558_v17  ;;  %761 = vmatpush.msra.mxu0 %v582_v36  ;;  %v608_v36 = vstv %s607_s17 }
 0x1e1   : > { %724 = vmatpush.msrb.mxu3 %v512_v38 }
 0x1e2   : > { %738 = vmatpush.msra.mxu1 %v556_v21  ;;  %762 = vmatpush.msra.mxu0 %v580_v40 }
 0x1e4   : > { %739 = vmatpush.msra.mxu1 %v554_v25  ;;  %763 = vmatpush.msra.mxu0 %v578_v42 }
 0x1e6   : > { %740 = vmatpush.msra.mxu1 %v552_v30  ;;  %764 = vmatpush.msra.mxu0 %v576_v46 }
 0x1e8   : > { %741 = vmatpush.msra.mxu1 %v550_v34 }
 0x1ea   : > { %742 = vmatpush.msra.mxu1 %v548_v39 }
 0x1ec   : > { %743 = vmatpush.msra.mxu1 %v546_v41 }
 0x1ee   : > { %744 = vmatpush.msra.mxu1 %v544_v44 }
 0x21b   : > { %v407_v27 = vpop.permute.xlu2 %406 }
 0x21c   : > { %v1110_v47 = vmul.f32 %v407_v27, %v1060_v2  ;;  %v1113_v48 = vmul.f32 %v407_v27, %v1064_v4 }
 0x22b   : > { %v425_v43 = vpop.permute.xlu2 %424 }
 0x22c   : > { %v1116_v49 = vmul.f32 %v425_v43, %v1074_v9  ;;  %v1119_v50 = vmul.f32 %v425_v43, %v1076_v10  ;;  %v471_v9 = vmul.f32 32.0, %v948_v45 }
 0x22e   : > { %v472_v62 = vsub.f32 1.0, %v471_v9 }
 0x230   : > { %v473_v15 = vmul.f32 %v948_v45, %v472_v62 }
 0x232   : > { %v419_v51 = vpop.permute.xlu1 %418  ;;  %v413_v52 = vpop.permute.xlu0 %412  ;;  %v474_v24 = vadd.f32 %v948_v45, %v473_v15 }
 0x233   : > { %v1122_v53 = vmul.f32 %v419_v51, %v1056_v0  ;;  %v1125_v54 = vmul.f32 %v419_v51, %v1058_v1  ;;  %v1128_v2 = vmul.f32 %v413_v52, %v1066_v5  ;;  %v1131_v4 = vmul.f32 %v413_v52, %v1068_v6 }
 0x234   : > { %v476_v31 = vsel %vm475_vm12, %v948_v45, %v474_v24 }
 0x235   : > { %v434_v10 = vmax.f32 %v1110_v47, %v1122_v53  ;;  %v443_v55 = vmax.f32 %v1113_v48, %v1125_v54  ;;  %v435_v0 = vmax.f32 %v1128_v2, %v1116_v49  ;;  %v444_v1 = vmax.f32 %v1131_v4, %v1119_v50 }
 0x236   : > { %v452_v5 = vadd.f32 %v1128_v2, %v1110_v47  ;;  %v461_v6 = vadd.f32 %v1131_v4, %v1113_v48 }
 0x237   : > { %v436_v56 = vmax.f32 %v434_v10, %v435_v0  ;;  %v445_v57 = vmax.f32 %v443_v55, %v444_v1 }
 0x238   : > { %v453_v58 = vadd.f32 %v452_v5, %v1122_v53  ;;  %v462_v59 = vadd.f32 %v461_v6, %v1125_v54 }
 0x239   : > { %v437_v60 = vrot.slane %v436_v56, 4  ;;  %v446_v61 = vrot.slane %v445_v57, 4 }
 0x23a   : > { %v454_v63 = vadd.f32 %v453_v58, %v1116_v49  ;;  %v463_v3 = vadd.f32 %v462_v59, %v1119_v50 }
 0x23b   : > { %v438_v7 = vmax.f32 %v436_v56, %v437_v60  ;;  %v447_v8 = vmax.f32 %v445_v57, %v446_v61 }
 0x23c   : > { %v455_v11 = vrot.slane %v454_v63, 4  ;;  %v464_v12 = vrot.slane %v463_v3, 4 }
 0x23d   : > { %v439_v13 = vrot.slane %v438_v7, 2  ;;  %v448_v14 = vrot.slane %v447_v8, 2 }
 0x23e   : > { %v456_v16 = vadd.f32 %v455_v11, %v454_v63  ;;  %v465_v17 = vadd.f32 %v464_v12, %v463_v3 }
 0x23f   : > { %v440_v18 = vmax.f32 %v438_v7, %v439_v13  ;;  %v449_v19 = vmax.f32 %v447_v8, %v448_v14 }
 0x240   : > { %v457_v20 = vrot.slane %v456_v16, 2  ;;  %v466_v21 = vrot.slane %v465_v17, 2 }
 0x241   : > { %v441_v22 = vrot.slane %v440_v18, 1  ;;  %v450_v23 = vrot.slane %v449_v19, 1 }
 0x242   : > { %v458_v25 = vadd.f32 %v457_v20, %v456_v16  ;;  %v467_v26 = vadd.f32 %v466_v21, %v465_v17 }
 0x243   : > { %v442_v27 = vmax.f32 %v440_v18, %v441_v22  ;;  %v451_v28 = vmax.f32 %v449_v19, %v450_v23 }
 0x244   : > { %v459_v29 = vrot.slane %v458_v25, 1  ;;  %v468_v30 = vrot.slane %v467_v26, 1 }
 0x245   : > { %625 = vmatmul.f32.vlgmr.msra.gmra.mxu2 %v442_v27  ;;  %645 = vmatmul.f32.vlgmr.msra.gmra.mxu3 %v451_v28 }
 0x246   : > { %v460_v32 = vadd.f32 %v459_v29, %v458_v25  ;;  %v469_v33 = vadd.f32 %v468_v30, %v467_v26 }
 0x248   : > { %v477_v34 = vmul.f32 %v476_v31, %v460_v32  ;;  %v478_v35 = vmul.f32 %v476_v31, %v469_v33 }
 0x24a   : > { %665 = vmatmul.f32.vlgmr.msrb.gmra.mxu1 %v477_v34  ;;  %685 = vmatmul.f32.vlgmr.msrb.gmra.mxu0 %v478_v35 }
 0x24d   : > { %705 = vmatmul.f32.vlgmr.msrb.gmra.mxu2 %v442_v27  ;;  %725 = vmatmul.f32.vlgmr.msrb.gmra.mxu3 %v451_v28 }
 0x252   : > { %745 = vmatmul.f32.vlgmr.msra.gmra.mxu1 %v477_v34  ;;  %765 = vmatmul.f32.vlgmr.msra.gmra.mxu0 %v478_v35 }
 0x2c7   : > { %v666_v40 = vpop.f32.mrf.mxu1  ;;  %v686_v42 = vpop.f32.mrf.mxu0 }
 0x2c8   : > { %v626_v37 = vpop.f32.mrf.mxu2  ;;  %v646_v38 = vpop.f32.mrf.mxu3 }
 0x2c9   : > { %v627_v39 = vadd.f32 %v626_v37, %v608_v36 }
 0x2cb   : > { %v647_v41 = vadd.f32 %v646_v38, %v627_v39 }
 0x2cd   : > { %v667_v43 = vadd.f32 %v666_v40, %v647_v41 }
 0x2cf   : > { %v687_v44 = vadd.f32 %v686_v42, %v667_v43  ;;  %v746_v10 = vpop.f32.mrf.mxu1  ;;  %v766_v0 = vpop.f32.mrf.mxu0 }
 0x2d0   : > { %v706_v45 = vpop.f32.mrf.mxu2  ;;  %v726_v52 = vpop.f32.mrf.mxu3 }
 0x2d1   : > { %v907_v46 = vmul.f32 -1.442695, %v687_v44  ;;  %v707_v51 = vadd.f32 %v706_v45, %v608_v36 }
 0x2d3   : > { %949 = vpow2.f32 %v907_v46  ;;  %v727_v9 = vadd.f32 %v726_v52, %v707_v51 }
 0x2d5   : > { %v747_v55 = vadd.f32 %v746_v10, %v727_v9 }
 0x2d7   : > { %v767_v1 = vadd.f32 %v766_v0, %v747_v55 }
 0x2d9   : > { %v950_v5 = vpop.eup %949  ;;  %v908_v6 = vmul.f32 -1.442695, %v767_v1 }
 0x2da   : > { %v775_v56 = vadd.f32 1.0, %v950_v5 }
 0x2db   : > { %951 = vpow2.f32 %v908_v6 }
 0x2dc   : > { %953 = vrcp.f32 %v775_v56  ;;  %v788_v62 = vand.u32 2147483648, %v775_v56  ;;  %v786_v3 = vand.u32 2147483647, %v775_v56  ;;  %vm782_vm14 = vweird.f32 %v775_v56 }
 0x2de   : > { %v789_v11 = vor.u32 1.1754944e-38, %v788_v62  ;;  %vm787_vm0 = vcmp.eq.f32.partialorder %v786_v3, 8.507059e+37 }
 0x2e1   : > { %v952_v57 = vpop.eup %951 }
 0x2e2   : > { %v954_v58 = vpop.eup %953  ;;  %v776_v59 = vadd.f32 1.0, %v952_v57 }
 0x2e3   : > { %v778_v60 = vmul.f32 %v954_v58, %v775_v56  ;;  %vm783_vm13 = vweird.f32 %v954_v58 }
 0x2e4   : > { %955 = vrcp.f32 %v776_v59  ;;  %vm784_vm15 = vmor %vm782_vm14, %vm783_vm13  ;;  %v803_v20 = vand.u32 2147483648, %v776_v59  ;;  %v801_v23 = vand.u32 2147483647, %v776_v59  ;;  %vm797_vm2 = vweird.f32 %v776_v59 }
 0x2e5   : > { %v779_v61 = vsub.f32 1.0, %v778_v60 }
 0x2e6   : > { %v804_v25 = vor.u32 1.1754944e-38, %v803_v20  ;;  %vm802_vm4 = vcmp.eq.f32.partialorder %v801_v23, 8.507059e+37 }
 0x2e7   : > { %v780_v63 = vmul.f32 %v954_v58, %v779_v61 }
 0x2e9   : > { %v781_v7 = vadd.f32 %v954_v58, %v780_v63 }
 0x2ea   : > { %v956_v8 = vpop.eup %955 }
 0x2eb   : > { %v785_v12 = vsel %vm784_vm15, %v954_v58, %v781_v7  ;;  %v793_v13 = vmul.f32 %v956_v8, %v776_v59  ;;  %vm798_vm1 = vweird.f32 %v956_v8 }
 0x2ec   : > { %v790_v14 = vsel %vm787_vm0, %v789_v11, %v785_v12  ;;  %vm799_vm3 = vmor %vm797_vm2, %vm798_vm1 }
 0x2ed   : > { %v807_v15 = vperm.slane %v790_v14, 0  ;;  %v794_v16 = vsub.f32 1.0, %v793_v13 }
 0x2ef   : > { %v809_v17 = vmul.f32 %v807_v15, %v1110_v47  ;;  %v811_v18 = vmul.f32 %v807_v15, %v1128_v2  ;;  %v813_v19 = vmul.f32 %v807_v15, %v1122_v53  ;;  %v815_v21 = vmul.f32 %v807_v15, %v1116_v49 }
 0x2f0   : > { %v795_v22 = vmul.f32 %v956_v8, %v794_v16 }
 0x2f1   : > { %817 = vst [vmem:[%s242_s21] sm:$0xff] %v809_v17 }
 0x2f2   : > { %819 = vst [vmem:[%s242_s21 + $0x10] sm:$0xff] %v811_v18  ;;  %v796_v24 = vadd.f32 %v956_v8, %v795_v22 }
 0x2f3   : > { %821 = vst [vmem:[%s242_s21 + $0x20] sm:$0xff] %v813_v19 }
 0x2f4   : > { %823 = vst [vmem:[%s242_s21 + $0x30] sm:$0xff] %v815_v21  ;;  %v800_v26 = vsel %vm799_vm3, %v956_v8, %v796_v24 }
 0x2f5   : > { %v805_v47 = vsel %vm802_vm4, %v804_v25, %v800_v26 }
 0x2f6   : > { %v808_v2 = vperm.slane %v805_v47, 0 }
 0x2f8   : > { %v810_v53 = vmul.f32 %v808_v2, %v1113_v48  ;;  %v812_v27 = vmul.f32 %v808_v2, %v1131_v4  ;;  %v814_v49 = vmul.f32 %v808_v2, %v1125_v54  ;;  %v816_v28 = vmul.f32 %v808_v2, %v1119_v50 }
 0x2fa   : > { %818 = vst [vmem:[%s242_s21 + $0x8] sm:$0xff] %v810_v53 }
 0x2fb   : > { %820 = vst [vmem:[%s242_s21 + $0x18] sm:$0xff] %v812_v27 }
 0x2fc   : > { %822 = vst [vmem:[%s242_s21 + $0x28] sm:$0xff] %v814_v49 }
 0x2fd   : > { %824 = vst [vmem:[%s242_s21 + $0x38] sm:$0xff] %v816_v28 }
 0x2fe PF: > { %s17_s20 = sadd.s32 1, %s997_s20  }
 0x2ff   : > { %p14_p7 = scmp.ge.s32.totalorder %s17_s20, 4  }
 0x301   :  { %16 = sbr.rel (!%p14_p7) target bundleno = 3 (0x3), region = 75 }
 0x306   :  { %846 = vsyncpa [#allocation4], 1 }
 0x307   :  { %848 = vsyncpa [#allocation4 + $0x1], 1 }

</bundles_post_ra>
